<compile_context>
chip_gen: v7x
topology: tpu7x:2x2x1
jax: 0.10.0
libtpu: 0.0.40
codegen_flags: <defaults>
</compile_context>

<pallas_src>
import functools

import jax
import jax.numpy as jnp
from jax import lax
from jax.experimental import pallas as pl
from jax.experimental.pallas import tpu as pltpu


_NEG_SLOPE = 0.01   # nn.LeakyReLU() default
_BN_EPS = 1e-5      # nn.BatchNorm2d default


# ---------------------------------------------------------------------------
# Kernel 1 (BN path, pass 1): packed conv matmul -> per-tile BN statistics
# ---------------------------------------------------------------------------
def _conv_stats_kernel(p_ref, w_ref, b_ref, stats_ref, *, m_valid):
    # p     : (TM, 2K) bf16 packed im2col patches [real | imag]
    # w     : (2K, L)  bf16 packed weights
    # b     : (1, L)   f32 packed effective bias
    # stats : (2, L)   f32 per-tile output: row0 = sum, row1 = sum of squares
    pid = pl.program_id(0)
    tm = p_ref.shape[0]
    conv = jnp.dot(p_ref[...], w_ref[...], preferred_element_type=jnp.float32)
    conv = conv + b_ref[...]
    # Mask rows that are only padding of M so batch statistics stay exact.
    row = pid * tm + lax.broadcasted_iota(jnp.int32, (tm, 1), 0)
    valid = (row < m_valid).astype(jnp.float32)
    cm = conv * valid
    s = jnp.sum(cm, axis=0, keepdims=True)           # (1, L)
    sq = jnp.sum(cm * cm, axis=0, keepdims=True)     # (1, L)
    stats_ref[...] = jnp.concatenate([s, sq], axis=0)


# ---------------------------------------------------------------------------
# Kernel 2 (BN path, pass 2): recompute conv + fused BN apply + LeakyReLU
# ---------------------------------------------------------------------------
def _conv_bn_lrelu_kernel(p_ref, w_ref, b_ref, scale_ref, shift_ref, out_ref):
    conv = jnp.dot(p_ref[...], w_ref[...], preferred_element_type=jnp.float32)
    conv = conv + b_ref[...]
    y = conv * scale_ref[...] + shift_ref[...]
    out_ref[...] = jnp.where(y >= 0, y, _NEG_SLOPE * y)


# ---------------------------------------------------------------------------
# Kernel 3 (last_layer): packed conv matmul fused with phase * tanh(|z|)
# ---------------------------------------------------------------------------
def _conv_tanh_kernel(p_ref, w_ref, b_ref, out_ref, *, half):
    conv = jnp.dot(p_ref[...], w_ref[...], preferred_element_type=jnp.float32)
    conv = conv + b_ref[...]
    # Pair each real lane c with imag lane c+half (and vice versa) via a lane
    # roll (XLU slot, nearly free); |z|^2 is identical for both halves.
    other = pltpu.roll(conv, shift=half, axis=1)
    magsq = conv * conv + other * other
    inv = lax.rsqrt(magsq + 1e-16)                    # ~ 1/|z|
    # tanh(|z|) / (|z| + 1e-8)  ~=  tanh(magsq*inv) * inv  (2 EUP pushes)
    out_ref[...] = conv * (jnp.tanh(magsq * inv) * inv)


# ---------------------------------------------------------------------------
# Wrapper
# ---------------------------------------------------------------------------
def decoder_forward(x, params, *, filter_size=(7, 5), stride_size=(2, 2),
                    padding=(0, 0), output_padding=(0, 0), last_layer=False,
                    tile_m=1024):
    """x: complex64 array, NCHW (N, Cin, H, W). Returns complex64 NCHW."""
    wr, wi, br, bi, g_re, beta_re, g_im, beta_im = params
    N, Cin, H, W_in = x.shape
    KH, KW = filter_size
    sh, sw = stride_size
    ph, pw = padding
    oph, opw = output_padding
    Cout = wr.shape[1]

    Hout = (H - 1) * sh - 2 * ph + KH + oph
    Wout = (W_in - 1) * sw - 2 * pw + KW + opw
    K = KH * KW * Cin
    K2 = 2 * K
    CH = 64 if Cout <= 64 else ((Cout + 127) // 128) * 128   # half lane width
    L = 2 * CH                                               # packed lanes

    M = N * Hout * Wout
    tm = max(8, ((M + 7) // 8) * 8) if M <= tile_m else tile_m   # single tile when small
    Mp = ((M + tm - 1) // tm) * tm
    num_tiles = Mp // tm

    # ---- glue: split complex, NCHW -> NHWC (bf16), zero-stuff + pad, im2col
    xr = jnp.transpose(jnp.real(x), (0, 2, 3, 1)).astype(jnp.bfloat16)
    xi = jnp.transpose(jnp.imag(x), (0, 2, 3, 1)).astype(jnp.bfloat16)
    zero = jnp.array(0, dtype=jnp.bfloat16)
    pad_cfg = [(0, 0, 0),
               (KH - 1 - ph, KH - 1 - ph + oph, sh - 1),
               (KW - 1 - pw, KW - 1 - pw + opw, sw - 1),
               (0, 0, 0)]
    xr_p = lax.pad(xr, zero, pad_cfg)
    xi_p = lax.pad(xi, zero, pad_cfg)

    def im2col(xp):
        cols = [xp[:, kh:kh + Hout, kw:kw + Wout, :]
                for kh in range(KH) for kw in range(KW)]
        return jnp.concatenate(cols, axis=-1).reshape(M, K)

    # TODO(synk): for deeper decoder layers (Cin=45/90) switch to implicit-GEMM
    # (loop over kh,kw inside the kernel) instead of materializing im2col.
    P = jnp.concatenate([im2col(xr_p), im2col(xi_p)], axis=-1)   # (M, 2K) bf16
    P = jnp.pad(P, ((0, Mp - M), (0, 0)))

    # ---- pack weights / bias (real lanes [0,Cout), imag lanes [CH,CH+Cout)) -
    def to_mat(w):  # torch convT weight (Cin, Cout, KH, KW) -> (K, Cout)
        wf = jnp.transpose(w[:, :, ::-1, ::-1], (2, 3, 0, 1))    # flip, KHKWCiCo
        return wf.reshape(K, Cout).astype(jnp.float32)

    Wre, Wim = to_mat(wr), to_mat(wi)
    Wpk = (jnp.zeros((K2, L), jnp.float32)
           .at[:K, :Cout].set(Wre).at[:K, CH:CH + Cout].set(Wim)
           .at[K:, :Cout].set(-Wim).at[K:, CH:CH + Cout].set(Wre)
           ).astype(jnp.bfloat16)
    # TODO(synk): bias combination assumes two real ConvTranspose2d layers each
    # with its own bias (real = convt_re(xr)-convt_im(xi), imag = convt_re(xi)+convt_im(xr)).
    bias = (jnp.zeros((1, L), jnp.float32)
            .at[0, :Cout].set(br - bi)
            .at[0, CH:CH + Cout].set(br + bi))

    # ---- Pallas calls -------------------------------------------------------
    grid = (num_tiles,)
    vmem_lim = 32 * 1024 * 1024
    conv_flops = 2 * Mp * K2 * L
    in_bytes = Mp * K2 * 2 + K2 * L * 2 + L * 4

    p_spec = pl.BlockSpec((tm, K2), lambda i: (i, 0))
    w_spec = pl.BlockSpec((K2, L), lambda i: (0, 0))
    b_spec = pl.BlockSpec((1, L), lambda i: (0, 0))
    out_spec = pl.BlockSpec((tm, L), lambda i: (i, 0))
    cparams = pltpu.CompilerParams(dimension_semantics=("parallel",),
                                   vmem_limit_bytes=vmem_lim)

    if last_layer:
        out2d = pl.pallas_call(
            functools.partial(_conv_tanh_kernel, half=CH),
            out_shape=jax.ShapeDtypeStruct((Mp, L), jnp.float32),
            grid=grid,
            in_specs=[p_spec, w_spec, b_spec],
            out_specs=out_spec,
            compiler_params=cparams,
            cost_estimate=pl.CostEstimate(
                flops=conv_flops, transcendentals=2 * Mp * L,
                bytes_accessed=in_bytes + Mp * L * 4),
        )(P, Wpk, bias)
    else:
        # Pass 1: statistics only; no f32 conv intermediate ever hits HBM.
        # Stats are per-tile outputs (not a resident accumulator) so the grid
        # axis stays 'parallel' (v7x megacore shards it); summed in the wrapper.
        stats = pl.pallas_call(
            functools.partial(_conv_stats_kernel, m_valid=M),
            out_shape=jax.ShapeDtypeStruct((num_tiles, 2, L), jnp.float32),
            grid=grid,
            in_specs=[p_spec, w_spec, b_spec],
            out_specs=pl.BlockSpec((None, 2, L), lambda i: (i, 0, 0)),
            compiler_params=cparams,
            cost_estimate=pl.CostEstimate(
                flops=conv_flops, transcendentals=0,
                bytes_accessed=in_bytes + num_tiles * 2 * L * 4),
        )(P, Wpk, bias)

        # Tiny per-channel math in plain JAX (training-mode batch statistics).
        # TODO(synk): ComplexBatchNorm2D source was not provided; this is the
        # naive per-part BatchNorm2d variant, not covariance-whitening complex BN.
        total = jnp.sum(stats, axis=0)                 # (2, L)
        mean = total[0] / M
        var = jnp.maximum(total[1] / M - mean * mean, 0.0)
        inv = lax.rsqrt(var + _BN_EPS)
        gamma = (jnp.zeros((L,), jnp.float32)
                 .at[:Cout].set(g_re).at[CH:CH + Cout].set(g_im))
        beta = (jnp.zeros((L,), jnp.float32)
                .at[:Cout].set(beta_re).at[CH:CH + Cout].set(beta_im))
        scale = (gamma * inv).reshape(1, L)
        shift = (beta - mean * gamma * inv).reshape(1, L)

        # Pass 2: recompute conv from cheap bf16 patches, fuse BN + LeakyReLU.
        out2d = pl.pallas_call(
            _conv_bn_lrelu_kernel,
            out_shape=jax.ShapeDtypeStruct((Mp, L), jnp.float32),
            grid=grid,
            in_specs=[p_spec, w_spec, b_spec, b_spec, b_spec],
            out_specs=out_spec,
            compiler_params=cparams,
            cost_estimate=pl.CostEstimate(
                flops=conv_flops, transcendentals=0,
                bytes_accessed=in_bytes + 2 * L * 4 + Mp * L * 4),
        )(P, Wpk, bias, scale, shift)

    # ---- unpack: (Mp, L) -> complex NCHW -----------------------------------
    # TODO(synk): if the consumer accepts NHWC / packed (M, L) this repack +
    # transpose pass (pure memory movement) can be dropped.
    out4d = out2d[:M].reshape(N, Hout, Wout, L)
    out = lax.complex(out4d[..., :Cout], out4d[..., CH:CH + Cout])
    return jnp.transpose(out, (0, 3, 1, 2))  # NHWC -> NCHW


def init_params(key, in_channels, out_channels, filter_size):
    KH, KW = filter_size
    k1, k2, k3, k4 = jax.random.split(key, 4)
    wr = 0.1 * jax.random.normal(k1, (in_channels, out_channels, KH, KW), jnp.float32)
    wi = 0.1 * jax.random.normal(k2, (in_channels, out_channels, KH, KW), jnp.float32)
    br = 0.1 * jax.random.normal(k3, (out_channels,), jnp.float32)
    bi = 0.1 * jax.random.normal(k4, (out_channels,), jnp.float32)
    g_re = jnp.ones((out_channels,), jnp.float32)
    beta_re = jnp.zeros((out_channels,), jnp.float32)
    g_im = jnp.ones((out_channels,), jnp.float32)
    beta_im = jnp.zeros((out_channels,), jnp.float32)
    return (wr, wi, br, bi, g_re, beta_re, g_im, beta_im)


if __name__ == "__main__":
    # Module defaults: filter (7,5), stride (2,2), in_ch=1, out_ch=45
    in_channels, out_channels = 1, 45
    filter_size, stride_size = (7, 5), (2, 2)
    N, Hin, Win = 2, 9, 7

    key = jax.random.PRNGKey(0)
    kp, kr, ki = jax.random.split(key, 3)
    params = init_params(kp, in_channels, out_channels, filter_size)

    x_re = jax.random.normal(kr, (N, in_channels, Hin, Win), jnp.float32)
    x_im = jax.random.normal(ki, (N, in_channels, Hin, Win), jnp.float32)
    x = lax.complex(x_re, x_im)  # (2, 1, 9, 7) complex64, NCHW

    # Default path: ComplexBatchNorm + LeakyReLU
    y = decoder_forward(x, params, filter_size=filter_size,
                        stride_size=stride_size, last_layer=False)
    y = jax.block_until_ready(y)
    assert y.shape == (N, out_channels, (Hin - 1) * 2 + 7, (Win - 1) * 2 + 5)
    assert y.dtype == jnp.complex64
    assert bool(jnp.all(jnp.isfinite(jnp.real(y)) & jnp.isfinite(jnp.imag(y))))

    # last_layer path: phase * tanh(|z|)
    y_last = decoder_forward(x, params, filter_size=filter_size,
                             stride_size=stride_size, last_layer=True)
    y_last = jax.block_until_ready(y_last)
    assert y_last.shape == y.shape and y_last.dtype == jnp.complex64
    assert bool(jnp.all(jnp.isfinite(jnp.real(y_last)) &
                        jnp.isfinite(jnp.imag(y_last))))
    assert bool(jnp.all(jnp.abs(y_last) <= 1.0 + 1e-4))  # tanh-bounded magnitude

    print("KERNEL_OK")
</pallas_src>

<mosaic_0001>
module attributes {stable_mosaic.version = 11 : i64} {
  func.func @_conv_stats_kernel(%arg0: i32, %arg1: memref<784x70xbf16, #tpu.memory_space<vmem>>, %arg2: memref<70x128xbf16, #tpu.memory_space<vmem>>, %arg3: memref<1x128xf32, #tpu.memory_space<vmem>>, %arg4: memref<1x2x128xf32, #tpu.memory_space<vmem>>) attributes {dimension_semantics = [#tpu.dimension_semantics<parallel>], iteration_bounds = array<i64: 1>, scalar_prefetch = 0 : i64, scratch_operands = 0 : i64, tpu.core_type = #tpu.core_type<tc>, window_params = [{transform_indices = @transform_0, window_bounds = array<i64: 784, 70>}, {pipeline_mode = #tpu.pipeline_mode<synchronous>, transform_indices = @transform_1, window_bounds = array<i64: 70, 128>}, {pipeline_mode = #tpu.pipeline_mode<synchronous>, transform_indices = @transform_2, window_bounds = array<i64: 1, 128>}, {transform_indices = @transform_3, window_bounds = array<i64: 1, 2, 128>}]} {
    %c0 = arith.constant 0 : index
    %c0_0 = arith.constant 0 : index
    %0 = vector.load %arg1[%c0, %c0_0] : memref<784x70xbf16, #tpu.memory_space<vmem>>, vector<784x70xbf16>
    %c0_1 = arith.constant 0 : index
    %c0_2 = arith.constant 0 : index
    %1 = vector.load %arg2[%c0_1, %c0_2] : memref<70x128xbf16, #tpu.memory_space<vmem>>, vector<70x128xbf16>
    %cst = arith.constant dense<0.000000e+00> : vector<784x128xf32>
    %2 = tpu.matmul %0, %1, %cst {dimension_numbers = #tpu.dot_dimension_numbers<[1], [0], [0], [1], [0, 0, 1, 1], [], []>} : vector<784x70xbf16>, vector<70x128xbf16>, vector<784x128xf32> -> vector<784x128xf32>
    %c0_3 = arith.constant 0 : index
    %c0_4 = arith.constant 0 : index
    %3 = vector.load %arg3[%c0_3, %c0_4] : memref<1x128xf32, #tpu.memory_space<vmem>>, vector<1x128xf32>
    %4 = vector.broadcast %3 : vector<1x128xf32> to vector<784x128xf32>
    %5 = arith.addf %2, %4 : vector<784x128xf32>
    %c784_i32 = arith.constant 784 : i32
    %6 = arith.muli %arg0, %c784_i32 : i32
    %7 = tpu.iota {dimensions = array<i32: 0>} : vector<784x1xi32>
    %8 = vector.broadcast %6 : i32 to vector<784x1xi32>
    %9 = arith.addi %8, %7 : vector<784x1xi32>
    %c782_i32 = arith.constant 782 : i32
    %10 = vector.broadcast %c782_i32 : i32 to vector<784x1xi32>
    %11 = arith.cmpi slt, %9, %10 : vector<784x1xi32>
    %12 = arith.extui %11 : vector<784x1xi1> to vector<784x1xi32>
    %13 = arith.sitofp %12 : vector<784x1xi32> to vector<784x1xf32>
    %14 = vector.broadcast %13 : vector<784x1xf32> to vector<784x128xf32>
    %15 = arith.mulf %5, %14 : vector<784x128xf32>
    %cst_5 = arith.constant dense<0.000000e+00> : vector<128xf32>
    %16 = vector.multi_reduction <add>, %15, %cst_5 [0] : vector<784x128xf32> to vector<128xf32>
    %17 = vector.shape_cast %16 : vector<128xf32> to vector<1x128xf32>
    %18 = arith.mulf %15, %15 : vector<784x128xf32>
    %cst_6 = arith.constant dense<0.000000e+00> : vector<128xf32>
    %19 = vector.multi_reduction <add>, %18, %cst_6 [0] : vector<784x128xf32> to vector<128xf32>
    %20 = vector.shape_cast %19 : vector<128xf32> to vector<1x128xf32>
    %21 = tpu.concatenate %17, %20 in 0 : vector<1x128xf32>, vector<1x128xf32> -> vector<2x128xf32>
    %c0_7 = arith.constant 0 : index
    %c0_8 = arith.constant 0 : index
    %c0_9 = arith.constant 0 : index
    %22 = vector.load %arg4[%c0_7, %c0_8, %c0_9] : memref<1x2x128xf32, #tpu.memory_space<vmem>>, vector<1x2x128xf32>
    %23 = vector.shape_cast %22 : vector<1x2x128xf32> to vector<2x128xf32>
    %24 = vector.shape_cast %21 : vector<2x128xf32> to vector<1x2x128xf32>
    tpu.vector_store %arg4[%c0_7, %c0_8, %c0_9], %24 {strides = array<i32>} : memref<1x2x128xf32, #tpu.memory_space<vmem>>, vector<1x2x128xf32>,
    return
  }
  func.func @transform_0(%arg0: i32) -> (i32, i32) {
    %c0_i32 = arith.constant 0 : i32
    %c0_i32_0 = arith.constant 0 : i32
    return %arg0, %c0_i32 : i32, i32
  }
  func.func @transform_1(%arg0: i32) -> (i32, i32) {
    %c0_i32 = arith.constant 0 : i32
    %c0_i32_0 = arith.constant 0 : i32
    %c0_i32_1 = arith.constant 0 : i32
    return %c0_i32, %c0_i32_0 : i32, i32
  }
  func.func @transform_2(%arg0: i32) -> (i32, i32) {
    %c0_i32 = arith.constant 0 : i32
    %c0_i32_0 = arith.constant 0 : i32
    %c0_i32_1 = arith.constant 0 : i32
    return %c0_i32, %c0_i32_0 : i32, i32
  }
  func.func @transform_3(%arg0: i32) -> (i32, i32, i32) {
    %c0_i32 = arith.constant 0 : i32
    %c0_i32_0 = arith.constant 0 : i32
    %c0_i32_1 = arith.constant 0 : i32
    return %arg0, %c0_i32, %c0_i32_0 : i32, i32, i32
  }
}

</mosaic_0001>

<bundles_post_ra>
// kernel: tpu_custom_call.1
= control target key start
LH: loop header
LB: loop body
LE: loop exit
PB: predicated region body
PF: predicated region fallthrough
CT: control target
= control target key end

     0   :  { %v2959_v1 = vmov 0.0   ;;  %vm2349_vm0 = vmmov 0   ;;  %vm550_vm1 = vcmask 1042432   ;;  %vm402_vm2 = vcmask 572416   ;;  %s2955_s0 = inlined_call_operand.vmem [shape: bf16[784,70], index: 0, kind: input, shape index: {}]   ;;  %s2956_s1 = inlined_call_operand.vmem [shape: bf16[70,128], index: 1, kind: input, shape index: {}]   ;;  %s2957_s2 = inlined_call_operand.vmem [shape: f32[1,128], index: 2, kind: input, shape index: {}]   ;;  %s2958_s3 = inlined_call_operand.hbm [shape: f32[1,2,128], index: 3, kind: output, shape index: {}]  }
   0x1   :  { %v2269_v0 = vld [vmem:[%s2956_s1] sm:$0xff]   ;;  %2050 = vmatprep.subr.bf16.mxu0 %v2959_v1  ;;  %2256 = vmatprep.subr.bf16.mxu1 %v2959_v1  ;;  %v2270_v2 = vld [vmem:[%s2956_s1 + $0x8] sm:$0xff]   ;;  %v2271_v3 = vld [vmem:[%s2956_s1 + $0x10] sm:$0xff]  }
   0x2   :  { %2051 = vmatpush3.bf16.msra.mxu0 %v2269_v0  ;;  %2261 = vmatpush3.bf16.msra.mxu1 %v2269_v0  ;;  %v2273_v4 = vld [vmem:[%s2956_s1 + $0x20] ss:$0 sps:$4 sm:$0x77]   ;;  %v2272_v5 = vld [vmem:[%s2956_s1 + $0x18] sm:$0xff]   ;;  %v2287_v8 = vld [vmem:[%s2955_s0 + $0xc8] sm:$0xff]  }
   0x3   :  { %2052 = vmatprep.subr.bf16.mxu0 %v2959_v1  ;;  %2060 = vmatprep.mubr.msk.bf16.mxu0 %vm2349_vm0, %v2959_v1  ;;  %v552_v6 = vsel %vm550_vm1, %v2273_v4, 0  ;;  %v2274_v7 = vld [vmem:[%s2955_s0] sm:$0xff]   ;;  %v2275_v9 = vld [vmem:[%s2955_s0 + $0x8] sm:$0xff]   ;;  %v2289_v10 = vld [vmem:[%s2955_s0 + $0xd0] sm:$0xff]  }
   0x4   :  { %2257 = vmatprep.subr.bf16.mxu1 %v2959_v1  ;;  %2160 = vmatprep.mubr.msk.bf16.mxu1 %vm2349_vm0, %v2959_v1  ;;  %v2276_v11 = vld [vmem:[%s2955_s0 + $0x10] sm:$0xff]   ;;  %v2291_v12 = vld [vmem:[%s2955_s0 + $0xd8] sm:$0xff]   ;;  %v2293_v14 = vld [vmem:[%s2955_s0 + $0xe0] sm:$0xff]  }
   0x5   :  { %v2277_v13 = vld [vmem:[%s2955_s0 + $0x18] sm:$0xff]  }
   0x6   :  { %2053 = vmatpush3.bf16.msra.mxu0 %v2270_v2  ;;  %2262 = vmatpush3.bf16.msra.mxu1 %v2270_v2 }
   0x7   :  { %2054 = vmatprep.subr.bf16.mxu0 %v2959_v1  ;;  %2258 = vmatprep.subr.bf16.mxu1 %v2959_v1 }
   0xa   :  { %2055 = vmatpush3.bf16.msra.mxu0 %v2271_v3  ;;  %2263 = vmatpush3.bf16.msra.mxu1 %v2271_v3 }
   0xb   :  { %2056 = vmatprep.subr.bf16.mxu0 %v2959_v1  ;;  %2259 = vmatprep.subr.bf16.mxu1 %v2959_v1 }
   0xe   :  { %2057 = vmatpush3.bf16.msra.mxu0 %v2272_v5  ;;  %2264 = vmatpush3.bf16.msra.mxu1 %v2272_v5 }
   0xf   :  { %2058 = vmatprep.subr.bf16.mxu0 %v2959_v1  ;;  %2260 = vmatprep.subr.bf16.mxu1 %v2959_v1 }
  0x12   :  { %2059 = vmatpush3.bf16.msra.mxu0 %v552_v6  ;;  %2265 = vmatpush3.bf16.msra.mxu1 %v552_v6 }
  0x15   :  { %2061 = vmatmul.mubr.msk.bf16.vlgmr.msra.gmra.mrb[0].mxu0 %vm402_vm2, %v2274_v7  ;;  %2161 = vmatmul.mubr.msk.bf16.vlgmr.msra.gmra.mrb[0].mxu1 %vm402_vm2, %v2287_v8 }
  0x16   :  { %2064 = vmatprep.mubr.msk.bf16.mxu0 %vm2349_vm0, %v2959_v1  ;;  %2164 = vmatprep.mubr.msk.bf16.mxu1 %vm2349_vm0, %v2959_v1 }
  0x1d   :  { %2065 = vmatmul.mubr.msk.bf16.gmra.mrb[4].mxu0 %vm402_vm2, %v2275_v9  ;;  %2165 = vmatmul.mubr.msk.bf16.gmra.mrb[4].mxu1 %vm402_vm2, %v2289_v10 }
  0x1e   :  { %2068 = vmatprep.mubr.msk.bf16.mxu0 %vm2349_vm0, %v2959_v1  ;;  %2168 = vmatprep.mubr.msk.bf16.mxu1 %vm2349_vm0, %v2959_v1 }
  0x25   :  { %2069 = vmatmul.mubr.msk.bf16.gmra.mrb[8].mxu0 %vm402_vm2, %v2276_v11  ;;  %2169 = vmatmul.mubr.msk.bf16.gmra.mrb[8].mxu1 %vm402_vm2, %v2291_v12 }
  0x26   :  { %2072 = vmatprep.mubr.msk.bf16.mxu0 %vm2349_vm0, %v2959_v1  ;;  %2172 = vmatprep.mubr.msk.bf16.mxu1 %vm2349_vm0, %v2959_v1 }
  0x2d   :  { %2073 = vmatmul.mubr.msk.bf16.gmra.mrb[12].mxu0 %vm402_vm2, %v2277_v13  ;;  %2173 = vmatmul.mubr.msk.bf16.gmra.mrb[12].mxu1 %vm402_vm2, %v2293_v14 }
  0x2e   :  { %2076 = vmatprep.mubr.msk.bf16.mxu0 %vm2349_vm0, %v2959_v1  ;;  %2176 = vmatprep.mubr.msk.bf16.mxu1 %vm2349_vm0, %v2959_v1 }
  0x2f   :  { %8 = vsyncpa [#allocation3], 0  ;;  %v2278_v15 = vld [vmem:[%s2955_s0 + $0x20] sm:$0xff]   ;;  %v2295_v16 = vld [vmem:[%s2955_s0 + $0xe8] sm:$0xff]   ;;  %vm1874_vm4 = vcmask 1040384  }
  0x30   :  { %v2279_v17 = vld [vmem:[%s2955_s0 + $0x28] sm:$0xff]   ;;  %v2297_v18 = vld [vmem:[%s2955_s0 + $0xf0] sm:$0xff]   ;;  %v2299_v20 = vld [vmem:[%s2955_s0 + $0xf8] sm:$0xff]  }
  0x31   :  { %v2280_v19 = vld [vmem:[%s2955_s0 + $0x30] sm:$0xff]   ;;  %v2281_v21 = vld [vmem:[%s2955_s0 + $0x38] sm:$0xff]   ;;  %v2301_v22 = vld [vmem:[%s2955_s0 + $0x100] sm:$0xff]  }
  0x32   :  { %v2282_v23 = vld [vmem:[%s2955_s0 + $0x40] sm:$0xff]   ;;  %v2303_v24 = vld [vmem:[%s2955_s0 + $0x108] sm:$0xff]   ;;  %v2305_v26 = vld [vmem:[%s2955_s0 + $0x110] sm:$0xff]  }
  0x33   :  { %v2283_v25 = vld [vmem:[%s2955_s0 + $0x48] sm:$0xff]   ;;  %v2284_v27 = vld [vmem:[%s2955_s0 + $0x50] sm:$0xff]   ;;  %v2307_v28 = vld [vmem:[%s2955_s0 + $0x118] sm:$0xff]  }
  0x34   :  { %v2285_v29 = vld [vmem:[%s2955_s0 + $0x58] sm:$0xff]   ;;  %v2309_v30 = vld [vmem:[%s2955_s0 + $0x120] sm:$0xff]   ;;  %v2311_v32 = vld [vmem:[%s2955_s0 + $0x128] sm:$0xff]  }
  0x35   :  { %2077 = vmatmul.mubr.msk.bf16.gmra.mrb[16].mxu0 %vm402_vm2, %v2278_v15  ;;  %2177 = vmatmul.mubr.msk.bf16.gmra.mrb[16].mxu1 %vm402_vm2, %v2295_v16  ;;  %v2286_v31 = vld [vmem:[%s2955_s0 + $0x60] sm:$0xff]   ;;  %v2288_v33 = vld [vmem:[%s2955_s0 + $0x68] sm:$0xff]   ;;  %v2312_v34 = vld [vmem:[%s2955_s0 + $0x130] sm:$0xff]  }
  0x36   :  { %2080 = vmatprep.mubr.msk.bf16.mxu0 %vm2349_vm0, %v2959_v1  ;;  %2180 = vmatprep.mubr.msk.bf16.mxu1 %vm2349_vm0, %v2959_v1  ;;  %v2290_v35 = vld [vmem:[%s2955_s0 + $0x70] sm:$0xff]   ;;  %v2313_v36 = vld [vmem:[%s2955_s0 + $0x138] sm:$0xff]   ;;  %v2314_v38 = vld [vmem:[%s2955_s0 + $0x140] sm:$0xff]  }
  0x37   :  { %v2292_v37 = vld [vmem:[%s2955_s0 + $0x78] sm:$0xff]   ;;  %v2294_v39 = vld [vmem:[%s2955_s0 + $0x80] sm:$0xff]   ;;  %v2315_v40 = vld [vmem:[%s2955_s0 + $0x148] sm:$0xff]  }
  0x38   :  { %v2296_v41 = vld [vmem:[%s2955_s0 + $0x88] sm:$0xff]   ;;  %v2316_v42 = vld [vmem:[%s2955_s0 + $0x150] sm:$0xff]   ;;  %v2317_v44 = vld [vmem:[%s2955_s0 + $0x158] sm:$0xff]  }
  0x39   :  { %v2298_v43 = vld [vmem:[%s2955_s0 + $0x90] sm:$0xff]   ;;  %v2300_v45 = vld [vmem:[%s2955_s0 + $0x98] sm:$0xff]   ;;  %v2318_v46 = vld [vmem:[%s2955_s0 + $0x160] sm:$0xff]  }
  0x3a   :  { %v2302_v47 = vld [vmem:[%s2955_s0 + $0xa0] sm:$0xff]   ;;  %v2319_v48 = vld [vmem:[%s2955_s0 + $0x168] sm:$0xff]   ;;  %v2320_v50 = vld [vmem:[%s2955_s0 + $0x170] sm:$0xff]  }
  0x3b   :  { %v2304_v49 = vld [vmem:[%s2955_s0 + $0xa8] sm:$0xff]   ;;  %v2306_v51 = vld [vmem:[%s2955_s0 + $0xb0] sm:$0xff]   ;;  %v2321_v52 = vld [vmem:[%s2955_s0 + $0x178] sm:$0xff]  }
  0x3c   :  { %v2308_v53 = vld [vmem:[%s2955_s0 + $0xb8] sm:$0xff]   ;;  %v2322_v54 = vld [vmem:[%s2955_s0 + $0x180] sm:$0xff]  }
  0x3d   :  { %2081 = vmatmul.mubr.msk.bf16.gmra.mrb[20].mxu0 %vm402_vm2, %v2279_v17  ;;  %2181 = vmatmul.mubr.msk.bf16.gmra.mrb[20].mxu1 %vm402_vm2, %v2297_v18  ;;  %v2310_v55 = vld [vmem:[%s2955_s0 + $0xc0] sm:$0xff]  }
  0x3e   :  { %2084 = vmatprep.mubr.msk.bf16.mxu0 %vm2349_vm0, %v2959_v1  ;;  %2184 = vmatprep.mubr.msk.bf16.mxu1 %vm2349_vm0, %v2959_v1  ;;  %v2693_v56 = vld [vmem:[%s2957_s2] ss:$0 sm:$0xff] }
  0x45   :  { %2085 = vmatmul.mubr.msk.bf16.gmra.mrb[24].mxu0 %vm402_vm2, %v2280_v19  ;;  %2185 = vmatmul.mubr.msk.bf16.gmra.mrb[24].mxu1 %vm402_vm2, %v2299_v20 }
  0x46   :  { %2088 = vmatprep.mubr.msk.bf16.mxu0 %vm2349_vm0, %v2959_v1  ;;  %2188 = vmatprep.mubr.msk.bf16.mxu1 %vm2349_vm0, %v2959_v1 }
  0x4d   :  { %2089 = vmatmul.mubr.msk.bf16.gmra.mrb[28].mxu0 %vm402_vm2, %v2281_v21  ;;  %2189 = vmatmul.mubr.msk.bf16.gmra.mrb[28].mxu1 %vm402_vm2, %v2301_v22 }
  0x4e   :  { %2092 = vmatprep.mubr.msk.bf16.mxu0 %vm2349_vm0, %v2959_v1  ;;  %2192 = vmatprep.mubr.msk.bf16.mxu1 %vm2349_vm0, %v2959_v1 }
  0x55   :  { %2093 = vmatmul.mubr.msk.bf16.gmra.mrb[32].mxu0 %vm402_vm2, %v2282_v23  ;;  %2193 = vmatmul.mubr.msk.bf16.gmra.mrb[32].mxu1 %vm402_vm2, %v2303_v24 }
  0x56   :  { %2096 = vmatprep.mubr.msk.bf16.mxu0 %vm2349_vm0, %v2959_v1  ;;  %2196 = vmatprep.mubr.msk.bf16.mxu1 %vm2349_vm0, %v2959_v1 }
  0x5d   :  { %2097 = vmatmul.mubr.msk.bf16.gmra.mrb[36].mxu0 %vm402_vm2, %v2283_v25  ;;  %2197 = vmatmul.mubr.msk.bf16.gmra.mrb[36].mxu1 %vm402_vm2, %v2305_v26 }
  0x5e   :  { %2100 = vmatprep.mubr.msk.bf16.mxu0 %vm2349_vm0, %v2959_v1  ;;  %2200 = vmatprep.mubr.msk.bf16.mxu1 %vm2349_vm0, %v2959_v1 }
  0x65   :  { %2101 = vmatmul.mubr.msk.bf16.gmra.mrb[40].mxu0 %vm402_vm2, %v2284_v27  ;;  %2201 = vmatmul.mubr.msk.bf16.gmra.mrb[40].mxu1 %vm402_vm2, %v2307_v28 }
  0x66   :  { %2104 = vmatprep.mubr.msk.bf16.mxu0 %vm2349_vm0, %v2959_v1  ;;  %2204 = vmatprep.mubr.msk.bf16.mxu1 %vm2349_vm0, %v2959_v1 }
  0x6d   :  { %2105 = vmatmul.mubr.msk.bf16.gmra.mrb[44].mxu0 %vm402_vm2, %v2285_v29  ;;  %2205 = vmatmul.mubr.msk.bf16.gmra.mrb[44].mxu1 %vm402_vm2, %v2309_v30 }
  0x6e   :  { %2108 = vmatprep.mubr.msk.bf16.mxu0 %vm2349_vm0, %v2959_v1  ;;  %2208 = vmatprep.mubr.msk.bf16.mxu1 %vm2349_vm0, %v2959_v1 }
  0x75   :  { %2109 = vmatmul.mubr.msk.bf16.gmra.mrb[48].mxu0 %vm402_vm2, %v2286_v31  ;;  %2209 = vmatmul.mubr.msk.bf16.gmra.mrb[48].mxu1 %vm402_vm2, %v2311_v32 }
  0x76   :  { %2112 = vmatprep.mubr.msk.bf16.mxu0 %vm2349_vm0, %v2959_v1  ;;  %2212 = vmatprep.mubr.msk.bf16.mxu1 %vm2349_vm0, %v2959_v1 }
  0x7d   :  { %2113 = vmatmul.mubr.msk.bf16.gmra.mrb[52].mxu0 %vm402_vm2, %v2288_v33  ;;  %2213 = vmatmul.mubr.msk.bf16.gmra.mrb[52].mxu1 %vm402_vm2, %v2312_v34 }
  0x7e   :  { %2116 = vmatprep.mubr.msk.bf16.mxu0 %vm2349_vm0, %v2959_v1  ;;  %2216 = vmatprep.mubr.msk.bf16.mxu1 %vm2349_vm0, %v2959_v1 }
  0x85   :  { %2117 = vmatmul.mubr.msk.bf16.gmra.mrb[56].mxu0 %vm402_vm2, %v2290_v35  ;;  %2217 = vmatmul.mubr.msk.bf16.gmra.mrb[56].mxu1 %vm402_vm2, %v2313_v36 }
  0x86   :  { %2120 = vmatprep.mubr.msk.bf16.mxu0 %vm2349_vm0, %v2959_v1  ;;  %2220 = vmatprep.mubr.msk.bf16.mxu1 %vm2349_vm0, %v2959_v1 }
  0x8d   :  { %2121 = vmatmul.mubr.msk.bf16.gmra.mrb[60].mxu0 %vm402_vm2, %v2292_v37  ;;  %2221 = vmatmul.mubr.msk.bf16.gmra.mrb[60].mxu1 %vm402_vm2, %v2314_v38 }
  0x8e   :  { %2124 = vmatprep.mubr.msk.bf16.mxu0 %vm2349_vm0, %v2959_v1  ;;  %2224 = vmatprep.mubr.msk.bf16.mxu1 %vm2349_vm0, %v2959_v1 }
  0x95   :  { %2125 = vmatmul.mubr.msk.bf16.gmra.mrb[64].mxu0 %vm402_vm2, %v2294_v39  ;;  %2225 = vmatmul.mubr.msk.bf16.gmra.mrb[64].mxu1 %vm402_vm2, %v2315_v40 }
  0x96   :  { %2128 = vmatprep.mubr.msk.bf16.mxu0 %vm2349_vm0, %v2959_v1  ;;  %2228 = vmatprep.mubr.msk.bf16.mxu1 %vm2349_vm0, %v2959_v1 }
  0x9d   :  { %2129 = vmatmul.mubr.msk.bf16.gmra.mrb[68].mxu0 %vm402_vm2, %v2296_v41  ;;  %2229 = vmatmul.mubr.msk.bf16.gmra.mrb[68].mxu1 %vm402_vm2, %v2316_v42 }
  0x9e   :  { %2132 = vmatprep.mubr.msk.bf16.mxu0 %vm2349_vm0, %v2959_v1  ;;  %2232 = vmatprep.mubr.msk.bf16.mxu1 %vm2349_vm0, %v2959_v1 }
  0xa5   :  { %2133 = vmatmul.mubr.msk.bf16.gmra.mrb[72].mxu0 %vm402_vm2, %v2298_v43  ;;  %2233 = vmatmul.mubr.msk.bf16.gmra.mrb[72].mxu1 %vm402_vm2, %v2317_v44 }
  0xa6   :  { %2136 = vmatprep.mubr.msk.bf16.mxu0 %vm2349_vm0, %v2959_v1  ;;  %2236 = vmatprep.mubr.msk.bf16.mxu1 %vm2349_vm0, %v2959_v1 }
  0xad   :  { %2137 = vmatmul.mubr.msk.bf16.gmra.mrb[76].mxu0 %vm402_vm2, %v2300_v45  ;;  %2237 = vmatmul.mubr.msk.bf16.gmra.mrb[76].mxu1 %vm402_vm2, %v2318_v46 }
  0xae   :  { %2140 = vmatprep.mubr.msk.bf16.mxu0 %vm2349_vm0, %v2959_v1  ;;  %2240 = vmatprep.mubr.msk.bf16.mxu1 %vm2349_vm0, %v2959_v1 }
  0xb5   :  { %2141 = vmatmul.mubr.msk.bf16.gmra.mrb[80].mxu0 %vm402_vm2, %v2302_v47  ;;  %2241 = vmatmul.mubr.msk.bf16.gmra.mrb[80].mxu1 %vm402_vm2, %v2319_v48 }
  0xb6   :  { %2144 = vmatprep.mubr.msk.bf16.mxu0 %vm2349_vm0, %v2959_v1  ;;  %2244 = vmatprep.mubr.msk.bf16.mxu1 %vm2349_vm0, %v2959_v1 }
  0xbd   :  { %2145 = vmatmul.mubr.msk.bf16.gmra.mrb[84].mxu0 %vm402_vm2, %v2304_v49  ;;  %2245 = vmatmul.mubr.msk.bf16.gmra.mrb[84].mxu1 %vm402_vm2, %v2320_v50 }
  0xbe   :  { %2148 = vmatprep.mubr.msk.bf16.mxu0 %vm2349_vm0, %v2959_v1  ;;  %2248 = vmatprep.mubr.msk.bf16.mxu1 %vm2349_vm0, %v2959_v1 }
  0xc5   :  { %2149 = vmatmul.mubr.msk.bf16.gmra.mrb[88].mxu0 %vm402_vm2, %v2306_v51  ;;  %2249 = vmatmul.mubr.msk.bf16.gmra.mrb[88].mxu1 %vm402_vm2, %v2321_v52 }
  0xc6   :  { %2152 = vmatprep.mubr.msk.bf16.mxu0 %vm2349_vm0, %v2959_v1  ;;  %2252 = vmatprep.mubr.msk.bf16.mxu1 %vm2349_vm0, %v2959_v1 }
  0xcd   :  { %2153 = vmatmul.mubr.msk.bf16.gmra.mrb[92].mxu0 %vm402_vm2, %v2308_v53  ;;  %2253 = vmatmul.mubr.msk.bf16.gmra.mrb[92].mxu1 %vm402_vm2, %v2322_v54 }
  0xce   :  { %2156 = vmatprep.mubr.msk.bf16.mxu0 %vm2349_vm0, %v2959_v1 }
  0xd5   :  { %2157 = vmatmul.mubr.msk.bf16.gmra.mrb[96].mxu0 %vm402_vm2, %v2310_v55 }
  0xe8   :  { %v588_v57 = vpop.f32.mrb[0].mxu0  ;;  %v2695_v58 = vpop.f32.mrb[0].mxu1 }
  0xe9   :  { %v589_v59 = vadd.f32 %v2693_v56, %v588_v57  ;;  %v2062_v60 = vpop.f32.mrb[1].mxu0  ;;  %v2162_v61 = vpop.f32.mrb[1].mxu1 }
  0xea   :  { %v591_v62 = vpop.f32.mrb[2].mxu0  ;;  %v2698_v63 = vpop.f32.mrb[2].mxu1 }
  0xeb   :  { %v592_v0 = vadd.f32 %v2693_v56, %v591_v62  ;;  %v2063_v2 = vpop.f32.mrb[3].mxu0  ;;  %v2163_v3 = vpop.f32.mrb[3].mxu1  ;;  %v1673_v4 = vmul.f32 %v589_v59, %v589_v59 }
  0xed   :  { %v1570_v5 = vadd.f32 %v592_v0, %v589_v59  ;;  %v1674_v6 = vmul.f32 %v592_v0, %v592_v0 }
  0xef   :  { %v1771_v7 = vadd.f32 %v1674_v6, %v1673_v4 }
  0xf0   :  { %v596_v8 = vpop.f32.mrb[4].mxu0  ;;  %v2701_v9 = vpop.f32.mrb[4].mxu1 }
  0xf1   :  { %v597_v10 = vadd.f32 %v2693_v56, %v596_v8  ;;  %v2066_v11 = vpop.f32.mrb[5].mxu0  ;;  %v2166_v12 = vpop.f32.mrb[5].mxu1 }
  0xf2   :  { %v599_v13 = vpop.f32.mrb[6].mxu0  ;;  %v2704_v14 = vpop.f32.mrb[6].mxu1 }
  0xf3   :  { %v1571_v15 = vadd.f32 %v1570_v5, %v597_v10  ;;  %v1675_v16 = vmul.f32 %v597_v10, %v597_v10  ;;  %v600_v17 = vadd.f32 %v2693_v56, %v599_v13  ;;  %v2067_v18 = vpop.f32.mrb[7].mxu0  ;;  %v2167_v19 = vpop.f32.mrb[7].mxu1 }
  0xf5   :  { %v1772_v20 = vadd.f32 %v1771_v7, %v1675_v16  ;;  %v1572_v21 = vadd.f32 %v1571_v15, %v600_v17  ;;  %v1676_v22 = vmul.f32 %v600_v17, %v600_v17 }
  0xf7   :  { %v1773_v23 = vadd.f32 %v1772_v20, %v1676_v22 }
  0xf8   :  { %v604_v24 = vpop.f32.mrb[8].mxu0  ;;  %v2707_v25 = vpop.f32.mrb[8].mxu1 }
  0xf9   :  { %v605_v26 = vadd.f32 %v2693_v56, %v604_v24  ;;  %v2070_v27 = vpop.f32.mrb[9].mxu0  ;;  %v2170_v28 = vpop.f32.mrb[9].mxu1 }
  0xfa   :  { %v607_v29 = vpop.f32.mrb[10].mxu0  ;;  %v2710_v30 = vpop.f32.mrb[10].mxu1 }
  0xfb   :  { %v1573_v31 = vadd.f32 %v1572_v21, %v605_v26  ;;  %v1677_v32 = vmul.f32 %v605_v26, %v605_v26  ;;  %v608_v33 = vadd.f32 %v2693_v56, %v607_v29  ;;  %v2071_v34 = vpop.f32.mrb[11].mxu0  ;;  %v2171_v35 = vpop.f32.mrb[11].mxu1 }
  0xfd   :  { %v1774_v36 = vadd.f32 %v1773_v23, %v1677_v32  ;;  %v1574_v37 = vadd.f32 %v1573_v31, %v608_v33  ;;  %v1678_v38 = vmul.f32 %v608_v33, %v608_v33 }
  0xff   :  { %v1775_v39 = vadd.f32 %v1774_v36, %v1678_v38 }
 0x100   :  { %v612_v40 = vpop.f32.mrb[12].mxu0  ;;  %v2713_v41 = vpop.f32.mrb[12].mxu1 }
 0x101   :  { %v613_v42 = vadd.f32 %v2693_v56, %v612_v40  ;;  %v2074_v43 = vpop.f32.mrb[13].mxu0  ;;  %v2174_v44 = vpop.f32.mrb[13].mxu1 }
 0x102   :  { %v615_v45 = vpop.f32.mrb[14].mxu0  ;;  %v2716_v46 = vpop.f32.mrb[14].mxu1 }
 0x103   :  { %v1575_v47 = vadd.f32 %v1574_v37, %v613_v42  ;;  %v1679_v48 = vmul.f32 %v613_v42, %v613_v42  ;;  %v616_v49 = vadd.f32 %v2693_v56, %v615_v45  ;;  %v2075_v50 = vpop.f32.mrb[15].mxu0  ;;  %v2175_v51 = vpop.f32.mrb[15].mxu1 }
 0x105   :  { %v1776_v52 = vadd.f32 %v1775_v39, %v1679_v48  ;;  %v1576_v53 = vadd.f32 %v1575_v47, %v616_v49  ;;  %v1680_v54 = vmul.f32 %v616_v49, %v616_v49 }
 0x107   :  { %v1777_v55 = vadd.f32 %v1776_v52, %v1680_v54 }
 0x108   :  { %v620_v57 = vpop.f32.mrb[16].mxu0  ;;  %v2719_v59 = vpop.f32.mrb[16].mxu1 }
 0x109   :  { %v621_v60 = vadd.f32 %v2693_v56, %v620_v57  ;;  %v2078_v61 = vpop.f32.mrb[17].mxu0  ;;  %v2178_v62 = vpop.f32.mrb[17].mxu1 }
 0x10a   :  { %v623_v0 = vpop.f32.mrb[18].mxu0  ;;  %v2722_v2 = vpop.f32.mrb[18].mxu1 }
 0x10b   :  { %v1577_v3 = vadd.f32 %v1576_v53, %v621_v60  ;;  %v1681_v4 = vmul.f32 %v621_v60, %v621_v60  ;;  %v624_v5 = vadd.f32 %v2693_v56, %v623_v0  ;;  %v2079_v6 = vpop.f32.mrb[19].mxu0  ;;  %v2179_v7 = vpop.f32.mrb[19].mxu1 }
 0x10d   :  { %v1778_v8 = vadd.f32 %v1777_v55, %v1681_v4  ;;  %v1578_v10 = vadd.f32 %v1577_v3, %v624_v5  ;;  %v1682_v11 = vmul.f32 %v624_v5, %v624_v5 }
 0x10f   :  { %v1779_v12 = vadd.f32 %v1778_v8, %v1682_v11 }
 0x110   :  { %v628_v13 = vpop.f32.mrb[20].mxu0  ;;  %v2725_v15 = vpop.f32.mrb[20].mxu1 }
 0x111   :  { %v629_v16 = vadd.f32 %v2693_v56, %v628_v13  ;;  %v2082_v17 = vpop.f32.mrb[21].mxu0  ;;  %v2182_v18 = vpop.f32.mrb[21].mxu1 }
 0x112   :  { %v631_v19 = vpop.f32.mrb[22].mxu0  ;;  %v2728_v20 = vpop.f32.mrb[22].mxu1 }
 0x113   :  { %v1579_v21 = vadd.f32 %v1578_v10, %v629_v16  ;;  %v1683_v22 = vmul.f32 %v629_v16, %v629_v16  ;;  %v632_v23 = vadd.f32 %v2693_v56, %v631_v19  ;;  %v2083_v24 = vpop.f32.mrb[23].mxu0  ;;  %v2183_v26 = vpop.f32.mrb[23].mxu1 }
 0x115   :  { %v1780_v27 = vadd.f32 %v1779_v12, %v1683_v22  ;;  %v1580_v28 = vadd.f32 %v1579_v21, %v632_v23  ;;  %v1684_v29 = vmul.f32 %v632_v23, %v632_v23 }
 0x117   :  { %v1781_v31 = vadd.f32 %v1780_v27, %v1684_v29 }
 0x118   :  { %v636_v32 = vpop.f32.mrb[24].mxu0  ;;  %v2731_v33 = vpop.f32.mrb[24].mxu1 }
 0x119   :  { %v637_v34 = vadd.f32 %v2693_v56, %v636_v32  ;;  %v2086_v35 = vpop.f32.mrb[25].mxu0  ;;  %v2186_v36 = vpop.f32.mrb[25].mxu1 }
 0x11a   :  { %v639_v37 = vpop.f32.mrb[26].mxu0  ;;  %v2734_v38 = vpop.f32.mrb[26].mxu1 }
 0x11b   :  { %v1581_v39 = vadd.f32 %v1580_v28, %v637_v34  ;;  %v1685_v40 = vmul.f32 %v637_v34, %v637_v34  ;;  %v640_v42 = vadd.f32 %v2693_v56, %v639_v37  ;;  %v2087_v43 = vpop.f32.mrb[27].mxu0  ;;  %v2187_v44 = vpop.f32.mrb[27].mxu1 }
 0x11d   :  { %v1782_v45 = vadd.f32 %v1781_v31, %v1685_v40  ;;  %v1582_v47 = vadd.f32 %v1581_v39, %v640_v42  ;;  %v1686_v48 = vmul.f32 %v640_v42, %v640_v42 }
 0x11f   :  { %v1783_v49 = vadd.f32 %v1782_v45, %v1686_v48 }
 0x120   :  { %v644_v50 = vpop.f32.mrb[28].mxu0  ;;  %v2737_v51 = vpop.f32.mrb[28].mxu1 }
 0x121   :  { %v645_v52 = vadd.f32 %v2693_v56, %v644_v50  ;;  %v2090_v53 = vpop.f32.mrb[29].mxu0  ;;  %v2190_v54 = vpop.f32.mrb[29].mxu1 }
 0x122   :  { %v647_v55 = vpop.f32.mrb[30].mxu0  ;;  %v2740_v57 = vpop.f32.mrb[30].mxu1 }
 0x123   :  { %v1583_v60 = vadd.f32 %v1582_v47, %v645_v52  ;;  %v1687_v61 = vmul.f32 %v645_v52, %v645_v52  ;;  %v648_v62 = vadd.f32 %v2693_v56, %v647_v55  ;;  %v2091_v0 = vpop.f32.mrb[31].mxu0  ;;  %v2191_v3 = vpop.f32.mrb[31].mxu1 }
 0x125   :  { %v1784_v4 = vadd.f32 %v1783_v49, %v1687_v61  ;;  %v1584_v5 = vadd.f32 %v1583_v60, %v648_v62  ;;  %v1688_v6 = vmul.f32 %v648_v62, %v648_v62 }
 0x127   :  { %v1785_v7 = vadd.f32 %v1784_v4, %v1688_v6 }
 0x128   :  { %v652_v8 = vpop.f32.mrb[32].mxu0  ;;  %v2743_v10 = vpop.f32.mrb[32].mxu1 }
 0x129   :  { %v653_v11 = vadd.f32 %v2693_v56, %v652_v8  ;;  %v2094_v12 = vpop.f32.mrb[33].mxu0  ;;  %v2194_v13 = vpop.f32.mrb[33].mxu1 }
 0x12a   :  { %v655_v16 = vpop.f32.mrb[34].mxu0  ;;  %v2746_v17 = vpop.f32.mrb[34].mxu1 }
 0x12b   :  { %v1585_v18 = vadd.f32 %v1584_v5, %v653_v11  ;;  %v1689_v19 = vmul.f32 %v653_v11, %v653_v11  ;;  %v656_v21 = vadd.f32 %v2693_v56, %v655_v16  ;;  %v2095_v22 = vpop.f32.mrb[35].mxu0  ;;  %v2195_v23 = vpop.f32.mrb[35].mxu1 }
 0x12d   :  { %v1786_v24 = vadd.f32 %v1785_v7, %v1689_v19  ;;  %v1586_v26 = vadd.f32 %v1585_v18, %v656_v21  ;;  %v1690_v27 = vmul.f32 %v656_v21, %v656_v21 }
 0x12f   :  { %v1787_v28 = vadd.f32 %v1786_v24, %v1690_v27 }
 0x130   :  { %v660_v29 = vpop.f32.mrb[36].mxu0  ;;  %v2749_v31 = vpop.f32.mrb[36].mxu1 }
 0x131   :  { %v661_v32 = vadd.f32 %v2693_v56, %v660_v29  ;;  %v2098_v34 = vpop.f32.mrb[37].mxu0  ;;  %v2198_v35 = vpop.f32.mrb[37].mxu1 }
 0x132   :  { %v663_v36 = vpop.f32.mrb[38].mxu0  ;;  %v2752_v37 = vpop.f32.mrb[38].mxu1 }
 0x133   :  { %v1587_v39 = vadd.f32 %v1586_v26, %v661_v32  ;;  %v1691_v40 = vmul.f32 %v661_v32, %v661_v32  ;;  %v664_v42 = vadd.f32 %v2693_v56, %v663_v36  ;;  %v2099_v43 = vpop.f32.mrb[39].mxu0  ;;  %v2199_v44 = vpop.f32.mrb[39].mxu1 }
 0x135   :  { %v1788_v45 = vadd.f32 %v1787_v28, %v1691_v40  ;;  %v1588_v47 = vadd.f32 %v1587_v39, %v664_v42  ;;  %v1692_v48 = vmul.f32 %v664_v42, %v664_v42 }
 0x137   :  { %v1789_v49 = vadd.f32 %v1788_v45, %v1692_v48 }
 0x138   :  { %v668_v50 = vpop.f32.mrb[40].mxu0  ;;  %v2755_v52 = vpop.f32.mrb[40].mxu1 }
 0x139   :  { %v669_v53 = vadd.f32 %v2693_v56, %v668_v50  ;;  %v2102_v54 = vpop.f32.mrb[41].mxu0  ;;  %v2202_v55 = vpop.f32.mrb[41].mxu1 }
 0x13a   :  { %v671_v60 = vpop.f32.mrb[42].mxu0  ;;  %v2758_v61 = vpop.f32.mrb[42].mxu1 }
 0x13b   :  { %v1589_v62 = vadd.f32 %v1588_v47, %v669_v53  ;;  %v1693_v0 = vmul.f32 %v669_v53, %v669_v53  ;;  %v672_v3 = vadd.f32 %v2693_v56, %v671_v60  ;;  %v2103_v4 = vpop.f32.mrb[43].mxu0  ;;  %v2203_v5 = vpop.f32.mrb[43].mxu1 }
 0x13d   :  { %v1790_v6 = vadd.f32 %v1789_v49, %v1693_v0  ;;  %v1590_v7 = vadd.f32 %v1589_v62, %v672_v3  ;;  %v1694_v8 = vmul.f32 %v672_v3, %v672_v3 }
 0x13f   :  { %v1791_v11 = vadd.f32 %v1790_v6, %v1694_v8 }
 0x140   :  { %v676_v12 = vpop.f32.mrb[44].mxu0  ;;  %v2761_v13 = vpop.f32.mrb[44].mxu1 }
 0x141   :  { %v677_v16 = vadd.f32 %v2693_v56, %v676_v12  ;;  %v2106_v18 = vpop.f32.mrb[45].mxu0  ;;  %v2206_v19 = vpop.f32.mrb[45].mxu1 }
 0x142   :  { %v679_v21 = vpop.f32.mrb[46].mxu0  ;;  %v2764_v22 = vpop.f32.mrb[46].mxu1 }
 0x143   :  { %v1591_v23 = vadd.f32 %v1590_v7, %v677_v16  ;;  %v1695_v24 = vmul.f32 %v677_v16, %v677_v16  ;;  %v680_v26 = vadd.f32 %v2693_v56, %v679_v21  ;;  %v2107_v27 = vpop.f32.mrb[47].mxu0  ;;  %v2207_v28 = vpop.f32.mrb[47].mxu1 }
 0x145   :  { %v1792_v29 = vadd.f32 %v1791_v11, %v1695_v24  ;;  %v1592_v32 = vadd.f32 %v1591_v23, %v680_v26  ;;  %v1696_v34 = vmul.f32 %v680_v26, %v680_v26 }
 0x147   :  { %v1793_v35 = vadd.f32 %v1792_v29, %v1696_v34 }
 0x148   :  { %v684_v36 = vpop.f32.mrb[48].mxu0  ;;  %v2767_v39 = vpop.f32.mrb[48].mxu1 }
 0x149   :  { %v685_v40 = vadd.f32 %v2693_v56, %v684_v36  ;;  %v2110_v42 = vpop.f32.mrb[49].mxu0  ;;  %v2210_v43 = vpop.f32.mrb[49].mxu1 }
 0x14a   :  { %v687_v44 = vpop.f32.mrb[50].mxu0  ;;  %v2770_v45 = vpop.f32.mrb[50].mxu1 }
 0x14b   :  { %v1593_v47 = vadd.f32 %v1592_v32, %v685_v40  ;;  %v1697_v48 = vmul.f32 %v685_v40, %v685_v40  ;;  %v688_v49 = vadd.f32 %v2693_v56, %v687_v44  ;;  %v2111_v50 = vpop.f32.mrb[51].mxu0  ;;  %v2211_v53 = vpop.f32.mrb[51].mxu1 }
 0x14d   :  { %v1794_v54 = vadd.f32 %v1793_v35, %v1697_v48  ;;  %v1594_v55 = vadd.f32 %v1593_v47, %v688_v49  ;;  %v1698_v60 = vmul.f32 %v688_v49, %v688_v49 }
 0x14f   :  { %v1795_v62 = vadd.f32 %v1794_v54, %v1698_v60 }
 0x150   :  { %v692_v0 = vpop.f32.mrb[52].mxu0  ;;  %v2773_v3 = vpop.f32.mrb[52].mxu1 }
 0x151   :  { %v693_v4 = vadd.f32 %v2693_v56, %v692_v0  ;;  %v2114_v5 = vpop.f32.mrb[53].mxu0  ;;  %v2214_v6 = vpop.f32.mrb[53].mxu1 }
 0x152   :  { %v695_v7 = vpop.f32.mrb[54].mxu0  ;;  %v2776_v8 = vpop.f32.mrb[54].mxu1 }
 0x153   :  { %v1595_v11 = vadd.f32 %v1594_v55, %v693_v4  ;;  %v1699_v12 = vmul.f32 %v693_v4, %v693_v4  ;;  %v696_v16 = vadd.f32 %v2693_v56, %v695_v7  ;;  %v2115_v18 = vpop.f32.mrb[55].mxu0  ;;  %v2215_v19 = vpop.f32.mrb[55].mxu1 }
 0x155   :  { %v1796_v21 = vadd.f32 %v1795_v62, %v1699_v12  ;;  %v1596_v23 = vadd.f32 %v1595_v11, %v696_v16  ;;  %v1700_v24 = vmul.f32 %v696_v16, %v696_v16 }
 0x157   :  { %v1797_v26 = vadd.f32 %v1796_v21, %v1700_v24 }
 0x158   :  { %v700_v27 = vpop.f32.mrb[56].mxu0  ;;  %v2779_v28 = vpop.f32.mrb[56].mxu1 }
 0x159   :  { %v701_v29 = vadd.f32 %v2693_v56, %v700_v27  ;;  %v2118_v32 = vpop.f32.mrb[57].mxu0  ;;  %v2218_v34 = vpop.f32.mrb[57].mxu1 }
 0x15a   :  { %v703_v35 = vpop.f32.mrb[58].mxu0  ;;  %v2782_v36 = vpop.f32.mrb[58].mxu1 }
 0x15b   :  { %v1597_v40 = vadd.f32 %v1596_v23, %v701_v29  ;;  %v1701_v42 = vmul.f32 %v701_v29, %v701_v29  ;;  %v704_v43 = vadd.f32 %v2693_v56, %v703_v35  ;;  %v2119_v44 = vpop.f32.mrb[59].mxu0  ;;  %v2219_v47 = vpop.f32.mrb[59].mxu1 }
 0x15d   :  { %v1798_v48 = vadd.f32 %v1797_v26, %v1701_v42  ;;  %v1598_v49 = vadd.f32 %v1597_v40, %v704_v43  ;;  %v1702_v50 = vmul.f32 %v704_v43, %v704_v43 }
 0x15f   :  { %v1799_v53 = vadd.f32 %v1798_v48, %v1702_v50 }
 0x160   :  { %v708_v54 = vpop.f32.mrb[60].mxu0  ;;  %v2785_v55 = vpop.f32.mrb[60].mxu1 }
 0x161   :  { %v709_v60 = vadd.f32 %v2693_v56, %v708_v54  ;;  %v2122_v62 = vpop.f32.mrb[61].mxu0  ;;  %v2222_v0 = vpop.f32.mrb[61].mxu1 }
 0x162   :  { %v711_v4 = vpop.f32.mrb[62].mxu0  ;;  %v2788_v5 = vpop.f32.mrb[62].mxu1 }
 0x163   :  { %v1599_v6 = vadd.f32 %v1598_v49, %v709_v60  ;;  %v1703_v7 = vmul.f32 %v709_v60, %v709_v60  ;;  %v712_v11 = vadd.f32 %v2693_v56, %v711_v4  ;;  %v2123_v12 = vpop.f32.mrb[63].mxu0  ;;  %v2223_v16 = vpop.f32.mrb[63].mxu1 }
 0x165   :  { %v1800_v18 = vadd.f32 %v1799_v53, %v1703_v7  ;;  %v1600_v19 = vadd.f32 %v1599_v6, %v712_v11  ;;  %v1704_v21 = vmul.f32 %v712_v11, %v712_v11 }
 0x167   :  { %v1801_v23 = vadd.f32 %v1800_v18, %v1704_v21 }
 0x168   :  { %v716_v24 = vpop.f32.mrb[64].mxu0  ;;  %v2791_v26 = vpop.f32.mrb[64].mxu1 }
 0x169   :  { %v717_v27 = vadd.f32 %v2693_v56, %v716_v24  ;;  %v2126_v29 = vpop.f32.mrb[65].mxu0  ;;  %v2226_v32 = vpop.f32.mrb[65].mxu1 }
 0x16a   :  { %v719_v34 = vpop.f32.mrb[66].mxu0  ;;  %v2794_v35 = vpop.f32.mrb[66].mxu1 }
 0x16b   :  { %v1601_v40 = vadd.f32 %v1600_v19, %v717_v27  ;;  %v1705_v42 = vmul.f32 %v717_v27, %v717_v27  ;;  %v720_v43 = vadd.f32 %v2693_v56, %v719_v34  ;;  %v2127_v44 = vpop.f32.mrb[67].mxu0  ;;  %v2227_v47 = vpop.f32.mrb[67].mxu1 }
 0x16d   :  { %v1802_v48 = vadd.f32 %v1801_v23, %v1705_v42  ;;  %v1602_v49 = vadd.f32 %v1601_v40, %v720_v43  ;;  %v1706_v50 = vmul.f32 %v720_v43, %v720_v43 }
 0x16f   :  { %v1803_v53 = vadd.f32 %v1802_v48, %v1706_v50 }
 0x170   :  { %v724_v54 = vpop.f32.mrb[68].mxu0  ;;  %v2797_v60 = vpop.f32.mrb[68].mxu1 }
 0x171   :  { %v725_v62 = vadd.f32 %v2693_v56, %v724_v54  ;;  %v2130_v0 = vpop.f32.mrb[69].mxu0  ;;  %v2230_v4 = vpop.f32.mrb[69].mxu1 }
 0x172   :  { %v727_v6 = vpop.f32.mrb[70].mxu0  ;;  %v2800_v7 = vpop.f32.mrb[70].mxu1 }
 0x173   :  { %v1603_v11 = vadd.f32 %v1602_v49, %v725_v62  ;;  %v1707_v12 = vmul.f32 %v725_v62, %v725_v62  ;;  %v728_v16 = vadd.f32 %v2693_v56, %v727_v6  ;;  %v2131_v18 = vpop.f32.mrb[71].mxu0  ;;  %v2231_v19 = vpop.f32.mrb[71].mxu1 }
 0x175   :  { %v1804_v21 = vadd.f32 %v1803_v53, %v1707_v12  ;;  %v1604_v23 = vadd.f32 %v1603_v11, %v728_v16  ;;  %v1708_v24 = vmul.f32 %v728_v16, %v728_v16 }
 0x177   :  { %v1805_v27 = vadd.f32 %v1804_v21, %v1708_v24 }
 0x178   :  { %v732_v29 = vpop.f32.mrb[72].mxu0  ;;  %v2803_v32 = vpop.f32.mrb[72].mxu1 }
 0x179   :  { %v733_v34 = vadd.f32 %v2693_v56, %v732_v29  ;;  %v2134_v40 = vpop.f32.mrb[73].mxu0  ;;  %v2234_v42 = vpop.f32.mrb[73].mxu1 }
 0x17a   :  { %v735_v43 = vpop.f32.mrb[74].mxu0  ;;  %v2806_v44 = vpop.f32.mrb[74].mxu1 }
 0x17b   :  { %v1605_v47 = vadd.f32 %v1604_v23, %v733_v34  ;;  %v1709_v48 = vmul.f32 %v733_v34, %v733_v34  ;;  %v736_v49 = vadd.f32 %v2693_v56, %v735_v43  ;;  %v2135_v50 = vpop.f32.mrb[75].mxu0  ;;  %v2235_v54 = vpop.f32.mrb[75].mxu1 }
 0x17d   :  { %v1806_v53 = vadd.f32 %v1805_v27, %v1709_v48  ;;  %v1606_v62 = vadd.f32 %v1605_v47, %v736_v49  ;;  %v1710_v0 = vmul.f32 %v736_v49, %v736_v49 }
 0x17f   :  { %v1807_v4 = vadd.f32 %v1806_v53, %v1710_v0 }
 0x180   :  { %v740_v6 = vpop.f32.mrb[76].mxu0  ;;  %v2809_v11 = vpop.f32.mrb[76].mxu1 }
 0x181   :  { %v741_v12 = vadd.f32 %v2693_v56, %v740_v6  ;;  %v2138_v16 = vpop.f32.mrb[77].mxu0  ;;  %v2238_v18 = vpop.f32.mrb[77].mxu1 }
 0x182   :  { %v743_v19 = vpop.f32.mrb[78].mxu0  ;;  %v2812_v21 = vpop.f32.mrb[78].mxu1 }
 0x183   :  { %v1607_v23 = vadd.f32 %v1606_v62, %v741_v12  ;;  %v1711_v24 = vmul.f32 %v741_v12, %v741_v12  ;;  %v744_v29 = vadd.f32 %v2693_v56, %v743_v19  ;;  %v2139_v34 = vpop.f32.mrb[79].mxu0  ;;  %v2239_v40 = vpop.f32.mrb[79].mxu1 }
 0x185   :  { %v1808_v27 = vadd.f32 %v1807_v4, %v1711_v24  ;;  %v1608_v42 = vadd.f32 %v1607_v23, %v744_v29  ;;  %v1712_v43 = vmul.f32 %v744_v29, %v744_v29 }
 0x187   :  { %v1809_v47 = vadd.f32 %v1808_v27, %v1712_v43 }
 0x188   :  { %v748_v48 = vpop.f32.mrb[80].mxu0  ;;  %v2815_v49 = vpop.f32.mrb[80].mxu1 }
 0x189   :  { %v749_v50 = vadd.f32 %v2693_v56, %v748_v48  ;;  %v2142_v54 = vpop.f32.mrb[81].mxu0  ;;  %v2242_v53 = vpop.f32.mrb[81].mxu1 }
 0x18a   :  { %v751_v0 = vpop.f32.mrb[82].mxu0  ;;  %v2818_v6 = vpop.f32.mrb[82].mxu1 }
 0x18b   :  { %v1609_v62 = vadd.f32 %v1608_v42, %v749_v50  ;;  %v1713_v12 = vmul.f32 %v749_v50, %v749_v50  ;;  %v752_v16 = vadd.f32 %v2693_v56, %v751_v0  ;;  %v2143_v18 = vpop.f32.mrb[83].mxu0  ;;  %v2243_v19 = vpop.f32.mrb[83].mxu1 }
 0x18d   :  { %v1810_v4 = vadd.f32 %v1809_v47, %v1713_v12  ;;  %v1610_v23 = vadd.f32 %v1609_v62, %v752_v16  ;;  %v1714_v24 = vmul.f32 %v752_v16, %v752_v16 }
 0x18f   :  { %v1811_v29 = vadd.f32 %v1810_v4, %v1714_v24 }
 0x190   :  { %v756_v34 = vpop.f32.mrb[84].mxu0  ;;  %v2821_v40 = vpop.f32.mrb[84].mxu1 }
 0x191   :  { %2960 = vst [vmem:[#allocation5_spill] sm:$0xff] %v2821_v40  ;;  %v757_v27 = vadd.f32 %v2693_v56, %v756_v34  ;;  %v2146_v43 = vpop.f32.mrb[85].mxu0  ;;  %v2246_v48 = vpop.f32.mrb[85].mxu1 }
 0x192   :  { %v759_v54 = vpop.f32.mrb[86].mxu0  ;;  %v2824_v53 = vpop.f32.mrb[86].mxu1 }
 0x193   :  { %2961 = vst [vmem:[#allocation6_spill] sm:$0xff] %v2824_v53  ;;  %v1611_v42 = vadd.f32 %v1610_v23, %v757_v27  ;;  %v1715_v50 = vmul.f32 %v757_v27, %v757_v27  ;;  %v760_v0 = vadd.f32 %v2693_v56, %v759_v54  ;;  %v2147_v18 = vpop.f32.mrb[87].mxu0  ;;  %v2247_v19 = vpop.f32.mrb[87].mxu1 }
 0x195   :  { %v1812_v47 = vadd.f32 %v1811_v29, %v1715_v50  ;;  %v1612_v62 = vadd.f32 %v1611_v42, %v760_v0  ;;  %v1716_v12 = vmul.f32 %v760_v0, %v760_v0 }
 0x197   :  { %v1813_v16 = vadd.f32 %v1812_v47, %v1716_v12 }
 0x198   :  { %v764_v4 = vpop.f32.mrb[88].mxu0  ;;  %v2827_v24 = vpop.f32.mrb[88].mxu1 }
 0x199   :  { %2962 = vst [vmem:[#allocation7_spill] sm:$0xff] %v2827_v24  ;;  %v765_v34 = vadd.f32 %v2693_v56, %v764_v4  ;;  %v2150_v43 = vpop.f32.mrb[89].mxu0  ;;  %v2250_v48 = vpop.f32.mrb[89].mxu1 }
 0x19a   :  { %v767_v1 = vpop.f32.mrb[90].mxu0  ;;  %v2830_v40 = vpop.f32.mrb[90].mxu1 }
 0x19b   :  { %v1613_v23 = vadd.f32 %v1612_v62, %v765_v34  ;;  %v1717_v27 = vmul.f32 %v765_v34, %v765_v34  ;;  %v768_v54 = vadd.f32 %v2693_v56, %v767_v1  ;;  %v2151_v18 = vpop.f32.mrb[91].mxu0  ;;  %v2251_v19 = vpop.f32.mrb[91].mxu1 }
 0x19d   :  { %v1814_v29 = vadd.f32 %v1813_v16, %v1717_v27  ;;  %v1614_v42 = vadd.f32 %v1613_v23, %v768_v54  ;;  %v1718_v50 = vmul.f32 %v768_v54, %v768_v54 }
 0x19f   :  { %v1815_v0 = vadd.f32 %v1814_v29, %v1718_v50 }
 0x1a0   :  { %v772_v47 = vpop.f32.mrb[92].mxu0  ;;  %v2833_v12 = vpop.f32.mrb[92].mxu1 }
 0x1a1   :  { %2963 = vst [vmem:[#allocation8_spill] sm:$0xff] %v2833_v12  ;;  %v773_v4 = vadd.f32 %v2693_v56, %v772_v47  ;;  %v2154_v43 = vpop.f32.mrb[93].mxu0  ;;  %v2254_v48 = vpop.f32.mrb[93].mxu1 }
 0x1a2   :  { %v775_v24 = vpop.f32.mrb[94].mxu0  ;;  %v2836_v53 = vpop.f32.mrb[94].mxu1  ;;  %v789_v43 = vadd.f32 %v2693_v56, %v2695_v58  ;;  %v800_v58 = vadd.f32 %v2693_v56, %v2704_v14 }
 0x1a3   :  { %2964 = vst [vmem:[#allocation9_spill] sm:$0xff] %v2836_v53  ;;  %v1615_v62 = vadd.f32 %v1614_v42, %v773_v4  ;;  %v1719_v34 = vmul.f32 %v773_v4, %v773_v4  ;;  %v776_v1 = vadd.f32 %v2693_v56, %v775_v24  ;;  %v2155_v18 = vpop.f32.mrb[95].mxu0  ;;  %v2255_v19 = vpop.f32.mrb[95].mxu1  ;;  %v792_v24 = vadd.f32 %v2693_v56, %v2698_v63 }
 0x1a4   :  { %v797_v18 = vadd.f32 %v2693_v56, %v2701_v9 }
 0x1a5   :  { %v1816_v16 = vadd.f32 %v1815_v0, %v1719_v34  ;;  %v1616_v23 = vadd.f32 %v1615_v62, %v776_v1  ;;  %v1720_v27 = vmul.f32 %v776_v1, %v776_v1  ;;  %v1723_v1 = vmul.f32 %v789_v43, %v789_v43 }
 0x1a7   :  { %v1817_v54 = vadd.f32 %v1816_v16, %v1720_v27  ;;  %v1724_v16 = vmul.f32 %v792_v24, %v792_v24 }
 0x1a8   :  { %v780_v29 = vpop.f32.mrb[96].mxu0 }
 0x1a9   :  { %v781_v50 = vadd.f32 %v2693_v56, %v780_v29  ;;  %v2158_v12 = vpop.f32.mrb[97].mxu0  ;;  %v1725_v29 = vmul.f32 %v797_v18, %v797_v18 }
 0x1aa   :  { %v783_v47 = vpop.f32.mrb[98].mxu0 }
 0x1ab   :  { %v1617_v48 = vadd.f32 %v1616_v23, %v781_v50  ;;  %v1721_v53 = vmul.f32 %v781_v50, %v781_v50  ;;  %v784_v42 = vadd.f32 %v2693_v56, %v783_v47  ;;  %v2159_v4 = vpop.f32.mrb[99].mxu0  ;;  %v805_v50 = vadd.f32 %v2693_v56, %v2707_v25 }
 0x1ac   :  { %v808_v47 = vadd.f32 %v2693_v56, %v2710_v30 }
 0x1ad   :  { %v1818_v0 = vadd.f32 %v1817_v54, %v1721_v53  ;;  %v1618_v62 = vadd.f32 %v1617_v48, %v784_v42  ;;  %v1722_v34 = vmul.f32 %v784_v42, %v784_v42  ;;  %v1726_v54 = vmul.f32 %v800_v58, %v800_v58 }
 0x1ae   :  { %v813_v42 = vadd.f32 %v2693_v56, %v2713_v41 }
 0x1af   :  { %v1619_v12 = vadd.f32 %v1618_v62, %v789_v43  ;;  %v1819_v19 = vadd.f32 %v1818_v0, %v1722_v34  ;;  %v1727_v43 = vmul.f32 %v805_v50, %v805_v50  ;;  %v816_v0 = vadd.f32 %v2693_v56, %v2716_v46 }
 0x1b0   :  { %v1729_v34 = vmul.f32 %v813_v42, %v813_v42 }
 0x1b1   :  { %v1620_v23 = vadd.f32 %v1619_v12, %v792_v24  ;;  %v1820_v27 = vadd.f32 %v1819_v19, %v1723_v1  ;;  %v1728_v24 = vmul.f32 %v808_v47, %v808_v47  ;;  %v821_v1 = vadd.f32 %v2693_v56, %v2719_v59 }
 0x1b2   :  { %v1730_v12 = vmul.f32 %v816_v0, %v816_v0  ;;  %v824_v19 = vadd.f32 %v2693_v56, %v2722_v2 }
 0x1b3   :  { %v1621_v63 = vadd.f32 %v1620_v23, %v797_v18  ;;  %v1821_v53 = vadd.f32 %v1820_v27, %v1724_v16  ;;  %v829_v23 = vadd.f32 %v2693_v56, %v2725_v15 }
 0x1b5   :  { %v1622_v48 = vadd.f32 %v1621_v63, %v800_v58  ;;  %v1822_v9 = vadd.f32 %v1821_v53, %v1725_v29  ;;  %v1731_v58 = vmul.f32 %v821_v1, %v821_v1  ;;  %v1732_v29 = vmul.f32 %v824_v19, %v824_v19 }
 0x1b6   :  { %v1733_v53 = vmul.f32 %v829_v23, %v829_v23 }
 0x1b7   :  { %v1623_v4 = vadd.f32 %v1622_v48, %v805_v50  ;;  %v1823_v14 = vadd.f32 %v1822_v9, %v1726_v54  ;;  %v832_v50 = vadd.f32 %v2693_v56, %v2728_v20  ;;  %v837_v54 = vadd.f32 %v2693_v56, %v2731_v33 }
 0x1b8   :  { %v840_v9 = vadd.f32 %v2693_v56, %v2734_v38 }
 0x1b9   :  { %v1624_v62 = vadd.f32 %v1623_v4, %v808_v47  ;;  %v1824_v25 = vadd.f32 %v1823_v14, %v1727_v43  ;;  %v1734_v48 = vmul.f32 %v832_v50, %v832_v50  ;;  %v845_v4 = vadd.f32 %v2693_v56, %v2737_v51 }
 0x1bb   :  { %v1625_v18 = vadd.f32 %v1624_v62, %v813_v42  ;;  %v1825_v30 = vadd.f32 %v1824_v25, %v1728_v24  ;;  %v1735_v42 = vmul.f32 %v837_v54, %v837_v54  ;;  %v1736_v24 = vmul.f32 %v840_v9, %v840_v9 }
 0x1bc   :  { %v1737_v25 = vmul.f32 %v845_v4, %v845_v4 }
 0x1bd   :  { %v1626_v16 = vadd.f32 %v1625_v18, %v816_v0  ;;  %v1826_v41 = vadd.f32 %v1825_v30, %v1729_v34  ;;  %v848_v0 = vadd.f32 %v2693_v56, %v2740_v57  ;;  %v853_v34 = vadd.f32 %v2693_v56, %v2743_v10 }
 0x1be   :  { %v856_v30 = vadd.f32 %v2693_v56, %v2746_v17 }
 0x1bf   :  { %v1627_v27 = vadd.f32 %v1626_v16, %v821_v1  ;;  %v1827_v46 = vadd.f32 %v1826_v41, %v1730_v12  ;;  %v1738_v18 = vmul.f32 %v848_v0, %v848_v0  ;;  %v861_v16 = vadd.f32 %v2693_v56, %v2749_v31 }
 0x1c1   :  { %v1628_v63 = vadd.f32 %v1627_v27, %v824_v19  ;;  %v1828_v59 = vadd.f32 %v1827_v46, %v1731_v58  ;;  %v1739_v19 = vmul.f32 %v853_v34, %v853_v34  ;;  %v1740_v58 = vmul.f32 %v856_v30, %v856_v30 }
 0x1c2   :  { %v1741_v46 = vmul.f32 %v861_v16, %v861_v16 }
 0x1c3   :  { %v1629_v47 = vadd.f32 %v1628_v63, %v829_v23  ;;  %v1829_v2 = vadd.f32 %v1828_v59, %v1732_v29  ;;  %v864_v23 = vadd.f32 %v2693_v56, %v2752_v37  ;;  %v869_v29 = vadd.f32 %v2693_v56, %v2755_v52 }
 0x1c4   :  { %v872_v59 = vadd.f32 %v2693_v56, %v2758_v61 }
 0x1c5   :  { %v1630_v43 = vadd.f32 %v1629_v47, %v832_v50  ;;  %v1830_v15 = vadd.f32 %v1829_v2, %v1733_v53  ;;  %v1742_v63 = vmul.f32 %v864_v23, %v864_v23  ;;  %v877_v47 = vadd.f32 %v2693_v56, %v2761_v13 }
 0x1c6   :  { %v888_v13 = vadd.f32 %v2693_v56, %v2770_v45 }
 0x1c7   :  { %v1831_v14 = vadd.f32 %v1830_v15, %v1734_v48  ;;  %v1631_v20 = vadd.f32 %v1630_v43, %v837_v54  ;;  %v1743_v54 = vmul.f32 %v869_v29, %v869_v29  ;;  %v1744_v48 = vmul.f32 %v872_v59, %v872_v59 }
 0x1c8   :  { %v1745_v15 = vmul.f32 %v877_v47, %v877_v47 }
 0x1c9   :  { %v1632_v62 = vadd.f32 %v1631_v20, %v840_v9  ;;  %v1832_v33 = vadd.f32 %v1831_v14, %v1735_v42  ;;  %v880_v9 = vadd.f32 %v2693_v56, %v2764_v22  ;;  %v885_v42 = vadd.f32 %v2693_v56, %v2767_v39 }
 0x1ca   :  { %v893_v22 = vadd.f32 %v2693_v56, %v2773_v3  ;;  %v896_v39 = vadd.f32 %v2693_v56, %v2776_v8 }
 0x1cb   :  { %v1633_v1 = vadd.f32 %v1632_v62, %v845_v4  ;;  %v1833_v38 = vadd.f32 %v1832_v33, %v1736_v24  ;;  %v1746_v14 = vmul.f32 %v880_v9, %v880_v9  ;;  %v1747_v62 = vmul.f32 %v885_v42, %v885_v42 }
 0x1cd   :  { %v1634_v12 = vadd.f32 %v1633_v1, %v848_v0  ;;  %v1834_v51 = vadd.f32 %v1833_v38, %v1737_v25  ;;  %v1748_v1 = vmul.f32 %v888_v13, %v888_v13 }
 0x1cf   :  { %v1635_v41 = vadd.f32 %v1634_v12, %v853_v34  ;;  %v1835_v57 = vadd.f32 %v1834_v51, %v1738_v18  ;;  %v901_v12 = vadd.f32 %v2693_v56, %v2779_v28 }
 0x1d1   :  { %v1636_v27 = vadd.f32 %v1635_v41, %v856_v30  ;;  %v1836_v10 = vadd.f32 %v1835_v57, %v1739_v19  ;;  %v1749_v30 = vmul.f32 %v893_v22, %v893_v22  ;;  %v1750_v19 = vmul.f32 %v896_v39, %v896_v39 }
 0x1d2   :  { %v1751_v57 = vmul.f32 %v901_v12, %v901_v12 }
 0x1d3   :  { %v1637_v50 = vadd.f32 %v1636_v27, %v861_v16  ;;  %v1837_v17 = vadd.f32 %v1836_v10, %v1740_v58  ;;  %v904_v16 = vadd.f32 %v2693_v56, %v2782_v36  ;;  %v909_v58 = vadd.f32 %v2693_v56, %v2785_v55  ;;  %v2906_v10 = vld [vmem:[%s2957_s2] ss:$0 sm:$0xff]  ;;  %s2350_s2 = smov [#allocation2]  }
 0x1d4   :  { %v912_v28 = vadd.f32 %v2906_v10, %v2788_v5  ;;  %v920_v55 = vadd.f32 %v2906_v10, %v2794_v35  ;;  %s1883_s11 = sshll.u32 %s2350_s2, 4  ;;  %s1884_s11 = int_to_ptr.vmem [resolvable:$true] %s1883_s11 }
 0x1d5   :  { %v1638_v53 = vadd.f32 %v1637_v50, %v864_v23  ;;  %v1838_v31 = vadd.f32 %v1837_v17, %v1741_v46  ;;  %v1752_v27 = vmul.f32 %v904_v16, %v904_v16  ;;  %v1753_v36 = vmul.f32 %v909_v58, %v909_v58  ;;  %s2324_s12 = scalar_lea.vmem %s1884_s11, 32  ;;  %p2329_p1 = scmp.lt.s32.totalorder %s1884_s11, %s1884_s11 }
 0x1d6   :  { %v917_v50 = vadd.f32 %v2906_v10, %v2791_v26  ;;  %v1754_v56 = vmul.f32 %v912_v28, %v912_v28  ;;  %p2325_p0 = scmp.ne.s32.totalorder %s1884_s11, %s2324_s12  ;;  %p2330_p2 = scmp.lt.s32.totalorder %s2324_s12, %s2324_s12 }
 0x1d7   :  { %v1639_v2 = vadd.f32 %v1638_v53, %v869_v29  ;;  %v1839_v37 = vadd.f32 %v1838_v31, %v1742_v63 }
 0x1d8   :  { %v1755_v31 = vmul.f32 %v917_v50, %v917_v50  ;;  %p2331_p3 = por %p2330_p2, %p2329_p1 }
 0x1d9   :  { %v1640_v43 = vadd.f32 %v1639_v2, %v872_v59  ;;  %v1840_v52 = vadd.f32 %v1839_v37, %v1743_v54  ;;  %v925_v54 = vadd.f32 %v2906_v10, %v2797_v60  ;;  %v1756_v2 = vmul.f32 %v920_v55, %v920_v55 }
 0x1da   :  { %v928_v37 = vadd.f32 %v2906_v10, %v2800_v7  ;;  %p2332_p4 = pnand %p2331_p3, %p2325_p0 }
 0x1db   :  { %v1641_v4 = vadd.f32 %v1640_v43, %v877_v47  ;;  %v1841_v61 = vadd.f32 %v1840_v52, %v1744_v48  ;;  %v933_v43 = vadd.f32 %v2906_v10, %v2803_v32 }
 0x1dd   :  { %v1642_v20 = vadd.f32 %v1641_v4, %v880_v9  ;;  %v1842_v24 = vadd.f32 %v1841_v61, %v1745_v15  ;;  %v1757_v9 = vmul.f32 %v925_v54, %v925_v54  ;;  %v1758_v15 = vmul.f32 %v928_v37, %v928_v37 }
 0x1de   :  { %v980_v4 = vlaneseq }
 0x1df   :  { %v1643_v0 = vadd.f32 %v1642_v20, %v885_v42  ;;  %v1843_v33 = vadd.f32 %v1842_v24, %v1746_v14  ;;  %v936_v42 = vadd.f32 %v2906_v10, %v2806_v44  ;;  %v1759_v14 = vmul.f32 %v933_v43, %v933_v43 }
 0x1e0   :  { %v941_v20 = vadd.f32 %v2906_v10, %v2809_v11  ;;  %v981_v32 = vshrl.u32 %v980_v4, 7  ;;  %v949_v44 = vadd.f32 %v2906_v10, %v2815_v49 }
 0x1e1   :  { %v1844_v25 = vadd.f32 %v1843_v33, %v1747_v62  ;;  %v1644_v34 = vadd.f32 %v1643_v0, %v888_v13  ;;  %v1760_v13 = vmul.f32 %v936_v42, %v936_v42  ;;  %v944_v0 = vadd.f32 %v2906_v10, %v2812_v21 }
 0x1e2   :  { %v1078_v11 = vadd.s32 776, %v981_v32 }
 0x1e3   :  { %v1845_v38 = vadd.f32 %v1844_v25, %v1748_v1  ;;  %v1645_v18 = vadd.f32 %v1644_v34, %v893_v22  ;;  %v1761_v22 = vmul.f32 %v941_v20, %v941_v20  ;;  %v1762_v1 = vmul.f32 %v944_v0, %v944_v0 }
 0x1e4   :  { %vm1275_vm3 = vcmp.lt.s32.totalorder %v1078_v11, 782 }
 0x1e5   :  { %v1846_v51 = vadd.f32 %v1845_v38, %v1749_v30  ;;  %v1646_v45 = vadd.f32 %v1645_v18, %v896_v39  ;;  %v952_v39 = vadd.f32 %v2906_v10, %v2818_v6  ;;  %v1763_v30 = vmul.f32 %v949_v44, %v949_v44 }
 0x1e7   :  { %v1847_v41 = vadd.f32 %v1846_v51, %v1750_v19  ;;  %v1647_v3 = vadd.f32 %v1646_v45, %v901_v12  ;;  %v2965_v12 = vld [vmem:[#allocation5_spill] sm:$0xff]  ;;  %v2966_v51 = vld [vmem:[#allocation6_spill] sm:$0xff] }
 0x1e8   :  { %v957_v21 = vadd.f32 %v2906_v10, %v2965_v12  ;;  %v960_v45 = vadd.f32 %v2906_v10, %v2966_v51 }
 0x1e9   :  { %v1848_v23 = vadd.f32 %v1847_v41, %v1751_v57  ;;  %v1648_v8 = vadd.f32 %v1647_v3, %v904_v16  ;;  %v1764_v41 = vmul.f32 %v952_v39, %v952_v39 }
 0x1ea   :  { %v1765_v57 = vmul.f32 %v957_v21, %v957_v21 }
 0x1eb   :  { %v1849_v46 = vadd.f32 %v1848_v23, %v1752_v27  ;;  %v1649_v29 = vadd.f32 %v1648_v8, %v909_v58  ;;  %v2967_v58 = vld [vmem:[#allocation7_spill] sm:$0xff]  ;;  %v1766_v23 = vmul.f32 %v960_v45, %v960_v45 }
 0x1ec   :  { %v965_v6 = vadd.f32 %v2906_v10, %v2967_v58 }
 0x1ed   :  { %v1850_v17 = vadd.f32 %v1849_v46, %v1753_v36  ;;  %v1650_v63 = vadd.f32 %v1649_v29, %v912_v28  ;;  %v968_v28 = vadd.f32 %v2906_v10, %v2830_v40  ;;  %v2968_v46 = vld [vmem:[#allocation9_spill] sm:$0xff]  ;;  %v2969_v36 = vmov 0.0  }
 0x1ee   :  { %v976_v29 = vadd.f32 %v2906_v10, %v2968_v46 }
 0x1ef   :  { %v1851_v59 = vadd.f32 %v1850_v17, %v1754_v56  ;;  %v1651_v53 = vadd.f32 %v1650_v63, %v917_v50  ;;  %v1995_v50 = vsel %vm1275_vm3, 1.0, %v2969_v36  ;;  %v1767_v56 = vmul.f32 %v965_v6, %v965_v6 }
 0x1f1   :  { %v1852_v47 = vadd.f32 %v1851_v59, %v1755_v31  ;;  %v1652_v5 = vadd.f32 %v1651_v53, %v920_v55  ;;  %v2970_v55 = vld [vmem:[#allocation8_spill] sm:$0xff] }
 0x1f2   :  { %v973_v59 = vadd.f32 %v2906_v10, %v2970_v55 }
 0x1f3   :  { %v1853_v48 = vadd.f32 %v1852_v47, %v1756_v2  ;;  %v1653_v26 = vadd.f32 %v1652_v5, %v925_v54  ;;  %v1768_v54 = vmul.f32 %v968_v28, %v968_v28  ;;  %v1569_v47 = vmul.f32 %v1995_v50, %v976_v29 }
 0x1f5   :  { %v1854_v52 = vadd.f32 %v1853_v48, %v1757_v9  ;;  %v1654_v35 = vadd.f32 %v1653_v26, %v928_v37  ;;  %v1769_v37 = vmul.f32 %v973_v59, %v973_v59  ;;  %v1770_v26 = vmul.f32 %v1569_v47, %v1569_v47 }
 0x1f7   :  { %v1855_v60 = vadd.f32 %v1854_v52, %v1758_v15  ;;  %v1655_v61 = vadd.f32 %v1654_v35, %v933_v43 }
 0x1f9   :  { %v1856_v7 = vadd.f32 %v1855_v60, %v1759_v14  ;;  %v1656_v24 = vadd.f32 %v1655_v61, %v936_v42 }
 0x1fb   :  { %v1857_v62 = vadd.f32 %v1856_v7, %v1760_v13  ;;  %v1657_v33 = vadd.f32 %v1656_v24, %v941_v20 }
 0x1fd   :  { %v1858_v25 = vadd.f32 %v1857_v62, %v1761_v22  ;;  %v1658_v34 = vadd.f32 %v1657_v33, %v944_v0 }
 0x1ff   :  { %v1859_v38 = vadd.f32 %v1858_v25, %v1762_v1  ;;  %v1659_v18 = vadd.f32 %v1658_v34, %v949_v44 }
 0x201   :  { %v1860_v19 = vadd.f32 %v1859_v38, %v1763_v30  ;;  %v1660_v16 = vadd.f32 %v1659_v18, %v952_v39 }
 0x203   :  { %v1861_v49 = vadd.f32 %v1860_v19, %v1764_v41  ;;  %v1661_v3 = vadd.f32 %v1660_v16, %v957_v21 }
 0x205   :  { %v1862_v8 = vadd.f32 %v1861_v49, %v1765_v57  ;;  %v1662_v27 = vadd.f32 %v1661_v3, %v960_v45 }
 0x207   :  { %v1863_v17 = vadd.f32 %v1862_v8, %v1766_v23  ;;  %v1663_v63 = vadd.f32 %v1662_v27, %v965_v6 }
 0x209   :  { %v1864_v53 = vadd.f32 %v1863_v17, %v1767_v56  ;;  %v1664_v31 = vadd.f32 %v1663_v63, %v968_v28 }
 0x20b   :  { %v1865_v5 = vadd.f32 %v1864_v53, %v1768_v54  ;;  %v1665_v2 = vadd.f32 %v1664_v31, %v973_v59 }
 0x20d   :  { %v1866_v48 = vadd.f32 %v1865_v5, %v1769_v37  ;;  %v1666_v40 = vadd.f32 %v1665_v2, %v1569_v47 }
 0x20f   :  { %v1667_v9 = vrot.slane %v1666_v40, 4  ;;  %v1867_v43 = vadd.f32 %v1866_v48, %v1770_v26 }
 0x211   :  { %v1668_v52 = vadd.f32 %v1667_v9, %v1666_v40  ;;  %v1868_v35 = vrot.slane %v1867_v43, 4 }
 0x213   :  { %v1669_v15 = vrot.slane %v1668_v52, 2  ;;  %v1869_v42 = vadd.f32 %v1868_v35, %v1867_v43 }
 0x215   :  { %v1670_v4 = vadd.f32 %v1669_v15, %v1668_v52  ;;  %v1870_v60 = vrot.slane %v1869_v42, 2 }
 0x217   :  { %v1671_v61 = vrot.slane %v1670_v4, 1  ;;  %v1871_v10 = vadd.f32 %v1870_v60, %v1869_v42 }
 0x219   :  { %v1872_v14 = vrot.slane %v1871_v10, 1  ;;  %v1672_v20 = vadd.f32 %v1671_v61, %v1670_v4 }
 0x21b   :  { %v1873_v7 = vadd.f32 %v1872_v14, %v1871_v10 }
 0x21d   :  { %v1875_v24 = vsel %vm1874_vm4, %v1672_v20, %v1873_v7 }
 0x21e   :  { %1876 = vst [vmem:[#allocation2] sm:$0x3] %v1875_v24 }
 0x21f   :  { %2335 = shalt.err (!%p2332_p4)
}
 0x220   :  { %s2336_s15 = scalar_lea.hbm %s2958_s3, 32 }
 0x221   :  { %p2337_p5 = scmp.ne.s32.totalorder %s2958_s3, %s2336_s15  ;;  %p2340_p6 = scmp.lt.u32.totalorder %s2336_s15, %s2958_s3 }
 0x223   :  { %p2342_p7 = pnand %p2340_p6, %p2337_p5 }
 0x225   :  { %2345 = shalt.err (!%p2342_p7)
}
 0x226   :  { %1886 = dma.vmem_to_hbm [thread:$0]  %s1884_s11, 32, %s2958_s3, [#allocation3]  }
 0x227   :  { %2346 = dma.done.wait [#allocation3], 32  }
 0x228   :  { %2347 = vsyncadd [#allocation3], 4294967264 }
 0x229   :  { %1890 = vsyncpa [#allocation3], 1 }

</bundles_post_ra>
